<compile_context>
chip_gen: v6e
topology: v6e:2x2x1
jax: 0.10.0
libtpu: 0.0.40
codegen_flags: <defaults>
</compile_context>

<pallas_src>
import jax
import jax.numpy as jnp
from jax.experimental import pallas as pl
from jax.experimental.pallas import tpu as pltpu

# Problem sizes (small, consistent with the module).
B = 2              # batch
C, H, W = 3, 16, 16
FEAT = C * H * W   # 768 (multiple of 128)
LOGITS = 1000      # backbone .logits width (HF image classifiers: 1000)
NUM_CLASSES = 10   # classifier output

# Padded / tiled sizes for the kernel.
LOGITS_PAD = 1024  # 1000 -> 1024 so every lane dim is a multiple of 128
OUT_PAD = 128      # 10 -> 128 lane-dense output slab (sliced in wrapper)
TK = 256           # LOGITS chunk per grid step (>= 256 to amortize overhead)
TB = 8             # batch tile (sublane-full)


def _pad_to(a, shape):
    """Zero-pad `a` up to `shape` (each dim only grows)."""
    pads = [(0, s - d) for d, s in zip(a.shape, shape)]
    return jnp.pad(a, pads)


def _finetuned_resnet_kernel(x_ref, wb_ref, bb_ref, wc_ref, bc_ref,
                             out_ref, acc_ref):
    """Per (batch-block i, logits-chunk k):
         logits_k = x @ wb[:, k] + bb[k]            (f32 accumulation on MXU)
         acc     += logits_k(bf16) @ wc[k, :]       (f32 accumulation on MXU)
       acc is initialized with the broadcast classifier bias on k == 0 and
       stored on the last chunk.
    """
    k = pl.program_id(1)

    @pl.when(k == 0)
    def _():
        acc_ref[...] = jnp.broadcast_to(bc_ref[...], acc_ref.shape)

    logits = jnp.dot(x_ref[...], wb_ref[...],
                     preferred_element_type=jnp.float32) + bb_ref[...]
    acc_ref[...] += jnp.dot(logits.astype(jnp.bfloat16), wc_ref[...],
                            preferred_element_type=jnp.float32)

    @pl.when(k == pl.num_programs(1) - 1)
    def _():
        out_ref[...] = acc_ref[...].astype(out_ref.dtype)


def finetuned_resnet_forward(x_nchw, wb, bb, wc, bc):
    """x_nchw: [B, C, H, W] float32 -> [B, NUM_CLASSES] float32.

    wb: [FEAT, LOGITS] backbone-stub projection (stored [in, out])
    bb: [1, LOGITS]    backbone-stub bias
    wc: [LOGITS, NUM_CLASSES] classifier weight (stored [in, out])
    bc: [1, NUM_CLASSES]      classifier bias
    """
    b = x_nchw.shape[0]
    x_flat = x_nchw.reshape(b, -1)
    feat = x_flat.shape[1]
    num_classes = wc.shape[1]

    # Pad batch to a sublane-full multiple of TB; pad lane dims to 128-multiples.
    b_pad = ((b + TB - 1) // TB) * TB
    x_p = _pad_to(x_flat, (b_pad, feat)).astype(jnp.bfloat16)
    wb_p = _pad_to(wb, (feat, LOGITS_PAD)).astype(jnp.bfloat16)
    bb_p = _pad_to(bb.reshape(1, -1), (1, LOGITS_PAD)).astype(jnp.float32)
    wc_p = _pad_to(wc, (LOGITS_PAD, OUT_PAD)).astype(jnp.bfloat16)
    bc_p = _pad_to(bc.reshape(1, -1), (1, OUT_PAD)).astype(jnp.float32)

    grid = (b_pad // TB, LOGITS_PAD // TK)

    out_padded = pl.pallas_call(
        _finetuned_resnet_kernel,
        out_shape=jax.ShapeDtypeStruct((b_pad, OUT_PAD), jnp.float32),
        grid=grid,
        in_specs=[
            # x block resident across the reduction axis.
            pl.BlockSpec((TB, feat), lambda i, k: (i, 0)),
            # Weight / bias chunks streamed along the LOGITS axis.
            pl.BlockSpec((feat, TK), lambda i, k: (0, k)),
            pl.BlockSpec((1, TK), lambda i, k: (0, k)),
            pl.BlockSpec((TK, OUT_PAD), lambda i, k: (k, 0)),
            pl.BlockSpec((1, OUT_PAD), lambda i, k: (0, 0)),
        ],
        # Same output block across k -> resident accumulator target.
        out_specs=pl.BlockSpec((TB, OUT_PAD), lambda i, k: (i, 0)),
        scratch_shapes=[pltpu.VMEM((TB, OUT_PAD), jnp.float32)],
        compiler_params=pltpu.CompilerParams(
            dimension_semantics=("parallel", "arbitrary"),
            vmem_limit_bytes=32 * 1024 * 1024,
        ),
    )(x_p, wb_p, bb_p, wc_p, bc_p)

    return out_padded[:b, :num_classes]


if __name__ == "__main__":
    key = jax.random.PRNGKey(0)
    k_x, k_wb, k_bb, k_wc, k_bc = jax.random.split(key, 5)

    # Deterministic synthetic parameters (shapes implied by the module):
    #  - backbone-stub projection: FEAT -> 1000 logits
    #  - classifier nn.Linear(1000, 10): stored as [in, out]
    x = jax.random.normal(k_x, (B, C, H, W), dtype=jnp.float32)
    wb = jax.random.normal(k_wb, (FEAT, LOGITS), dtype=jnp.float32) * 0.02
    bb = jax.random.normal(k_bb, (1, LOGITS), dtype=jnp.float32) * 0.02
    wc = jax.random.normal(k_wc, (LOGITS, NUM_CLASSES), dtype=jnp.float32) * 0.02
    bc = jax.random.normal(k_bc, (1, NUM_CLASSES), dtype=jnp.float32) * 0.02

    out = finetuned_resnet_forward(x, wb, bb, wc, bc)
    out = jax.block_until_ready(out)

    # Cross-check against a plain-JAX f32 reference of the same math.
    # Tolerance is loosened because the kernel streams weights/activations as
    # bf16 (f32 accumulation).
    x_flat = x.reshape(B, -1)
    ref = (x_flat @ wb + bb) @ wc + bc
    assert out.shape == (B, NUM_CLASSES)
    assert jnp.allclose(out, ref, atol=2e-2, rtol=2e-2), (
        float(jnp.max(jnp.abs(out - ref))))

    print("KERNEL_OK")
</pallas_src>

<mosaic_0001>
module attributes {stable_mosaic.version = 11 : i64} {
  func.func @_finetuned_resnet_kernel(%arg0: i32, %arg1: i32, %arg2: memref<8x768xbf16, #tpu.memory_space<vmem>>, %arg3: memref<768x256xbf16, #tpu.memory_space<vmem>>, %arg4: memref<1x256xf32, #tpu.memory_space<vmem>>, %arg5: memref<256x128xbf16, #tpu.memory_space<vmem>>, %arg6: memref<1x128xf32, #tpu.memory_space<vmem>>, %arg7: memref<8x128xf32, #tpu.memory_space<vmem>>, %arg8: memref<8x128xf32, #tpu.memory_space<vmem>>) attributes {dimension_semantics = [#tpu.dimension_semantics<parallel>, #tpu.dimension_semantics<arbitrary>], iteration_bounds = array<i64: 1, 4>, scalar_prefetch = 0 : i64, scratch_operands = 1 : i64, tpu.core_type = #tpu.core_type<tc>, window_params = [{transform_indices = @transform_0, window_bounds = array<i64: 8, 768>}, {transform_indices = @transform_1, window_bounds = array<i64: 768, 256>}, {transform_indices = @transform_2, window_bounds = array<i64: 1, 256>}, {transform_indices = @transform_3, window_bounds = array<i64: 256, 128>}, {pipeline_mode = #tpu.pipeline_mode<synchronous>, transform_indices = @transform_4, window_bounds = array<i64: 1, 128>}, {transform_indices = @transform_5, window_bounds = array<i64: 8, 128>}]} {
    %c0_i32 = arith.constant 0 : i32
    %0 = arith.cmpi eq, %arg1, %c0_i32 : i32
    %1 = arith.extui %0 : i1 to i32
    %c0_i32_0 = arith.constant 0 : i32
    %2 = arith.cmpi ne, %1, %c0_i32_0 : i32
    scf.if %2 {
      %c0_14 = arith.constant 0 : index
      %c0_15 = arith.constant 0 : index
      %18 = vector.load %arg6[%c0_14, %c0_15] : memref<1x128xf32, #tpu.memory_space<vmem>>, vector<1x128xf32>
      %19 = vector.shape_cast %18 : vector<1x128xf32> to vector<1x128xf32>
      %20 = vector.broadcast %19 : vector<1x128xf32> to vector<8x128xf32>
      %c0_16 = arith.constant 0 : index
      %c0_17 = arith.constant 0 : index
      %21 = vector.load %arg8[%c0_16, %c0_17] : memref<8x128xf32, #tpu.memory_space<vmem>>, vector<8x128xf32>
      tpu.vector_store %arg8[%c0_16, %c0_17], %20 {strides = array<i32>} : memref<8x128xf32, #tpu.memory_space<vmem>>, vector<8x128xf32>,
    } else {
    }
    %c0 = arith.constant 0 : index
    %c0_1 = arith.constant 0 : index
    %3 = vector.load %arg2[%c0, %c0_1] : memref<8x768xbf16, #tpu.memory_space<vmem>>, vector<8x768xbf16>
    %c0_2 = arith.constant 0 : index
    %c0_3 = arith.constant 0 : index
    %4 = vector.load %arg3[%c0_2, %c0_3] : memref<768x256xbf16, #tpu.memory_space<vmem>>, vector<768x256xbf16>
    %cst = arith.constant dense<0.000000e+00> : vector<8x256xf32>
    %5 = tpu.matmul %3, %4, %cst {dimension_numbers = #tpu.dot_dimension_numbers<[1], [0], [0], [1], [0, 0, 1, 1], [], []>} : vector<8x768xbf16>, vector<768x256xbf16>, vector<8x256xf32> -> vector<8x256xf32>
    %c0_4 = arith.constant 0 : index
    %c0_5 = arith.constant 0 : index
    %6 = vector.load %arg4[%c0_4, %c0_5] : memref<1x256xf32, #tpu.memory_space<vmem>>, vector<1x256xf32>
    %7 = vector.broadcast %6 : vector<1x256xf32> to vector<8x256xf32>
    %8 = arith.addf %5, %7 : vector<8x256xf32>
    %c0_6 = arith.constant 0 : index
    %c0_7 = arith.constant 0 : index
    %9 = vector.load %arg8[%c0_6, %c0_7] : memref<8x128xf32, #tpu.memory_space<vmem>>, vector<8x128xf32>
    %10 = arith.truncf %8 : vector<8x256xf32> to vector<8x256xbf16>
    %c0_8 = arith.constant 0 : index
    %c0_9 = arith.constant 0 : index
    %11 = vector.load %arg5[%c0_8, %c0_9] : memref<256x128xbf16, #tpu.memory_space<vmem>>, vector<256x128xbf16>
    %cst_10 = arith.constant dense<0.000000e+00> : vector<8x128xf32>
    %12 = tpu.matmul %10, %11, %cst_10 {dimension_numbers = #tpu.dot_dimension_numbers<[1], [0], [0], [1], [0, 0, 1, 1], [], []>} : vector<8x256xbf16>, vector<256x128xbf16>, vector<8x128xf32> -> vector<8x128xf32>
    %13 = arith.addf %9, %12 : vector<8x128xf32>
    %c0_11 = arith.constant 0 : index
    %c0_12 = arith.constant 0 : index
    %14 = vector.load %arg8[%c0_11, %c0_12] : memref<8x128xf32, #tpu.memory_space<vmem>>, vector<8x128xf32>
    tpu.vector_store %arg8[%c0_11, %c0_12], %13 {strides = array<i32>} : memref<8x128xf32, #tpu.memory_space<vmem>>, vector<8x128xf32>,
    %c3_i32 = arith.constant 3 : i32
    %15 = arith.cmpi eq, %arg1, %c3_i32 : i32
    %16 = arith.extui %15 : i1 to i32
    %c0_i32_13 = arith.constant 0 : i32
    %17 = arith.cmpi ne, %16, %c0_i32_13 : i32
    scf.if %17 {
      %c0_14 = arith.constant 0 : index
      %c0_15 = arith.constant 0 : index
      %18 = vector.load %arg8[%c0_14, %c0_15] : memref<8x128xf32, #tpu.memory_space<vmem>>, vector<8x128xf32>
      %c0_16 = arith.constant 0 : index
      %c0_17 = arith.constant 0 : index
      %19 = vector.load %arg7[%c0_16, %c0_17] : memref<8x128xf32, #tpu.memory_space<vmem>>, vector<8x128xf32>
      tpu.vector_store %arg7[%c0_16, %c0_17], %18 {strides = array<i32>} : memref<8x128xf32, #tpu.memory_space<vmem>>, vector<8x128xf32>,
    } else {
    }
    return
  }
  func.func @transform_0(%arg0: i32, %arg1: i32) -> (i32, i32) {
    %c0_i32 = arith.constant 0 : i32
    %c0_i32_0 = arith.constant 0 : i32
    return %arg0, %c0_i32 : i32, i32
  }
  func.func @transform_1(%arg0: i32, %arg1: i32) -> (i32, i32) {
    %c0_i32 = arith.constant 0 : i32
    %c0_i32_0 = arith.constant 0 : i32
    return %c0_i32, %arg1 : i32, i32
  }
  func.func @transform_2(%arg0: i32, %arg1: i32) -> (i32, i32) {
    %c0_i32 = arith.constant 0 : i32
    %c0_i32_0 = arith.constant 0 : i32
    return %c0_i32, %arg1 : i32, i32
  }
  func.func @transform_3(%arg0: i32, %arg1: i32) -> (i32, i32) {
    %c0_i32 = arith.constant 0 : i32
    %c0_i32_0 = arith.constant 0 : i32
    return %arg1, %c0_i32 : i32, i32
  }
  func.func @transform_4(%arg0: i32, %arg1: i32) -> (i32, i32) {
    %c0_i32 = arith.constant 0 : i32
    %c0_i32_0 = arith.constant 0 : i32
    %c0_i32_1 = arith.constant 0 : i32
    return %c0_i32, %c0_i32_0 : i32, i32
  }
  func.func @transform_5(%arg0: i32, %arg1: i32) -> (i32, i32) {
    %c0_i32 = arith.constant 0 : i32
    %c0_i32_0 = arith.constant 0 : i32
    return %arg0, %c0_i32 : i32, i32
  }
}

</mosaic_0001>

<bundles_post_ra>
// kernel: tpu_custom_call.1
= control target key start
LH: loop header
LB: loop body
LE: loop exit
PB: predicated region body
PF: predicated region fallthrough
CT: control target
= control target key end

     0   :  { %s2439_s0 = inlined_call_operand.hbm [shape: bf16[8,768], index: 0, kind: input, shape index: {}]   ;;  %s2440_s1 = inlined_call_operand.hbm [shape: bf16[768,1024], index: 1, kind: input, shape index: {}]   ;;  %s2441_s2 = inlined_call_operand.hbm [shape: f32[1,1024], index: 2, kind: input, shape index: {}]   ;;  %s2442_s3 = inlined_call_operand.hbm [shape: bf16[1024,128], index: 3, kind: input, shape index: {}]   ;;  %s2443_s4 = inlined_call_operand.hbm [shape: f32[1,128], index: 4, kind: input, shape index: {}]   ;;  %s2444_s5 = inlined_call_operand.hbm [shape: f32[8,128], index: 5, kind: output, shape index: {}]  }
   0x1   :  { %2447 = sst [smem:[#allocation18_spill]] %s2439_s0 }
   0x2   :  { %2448 = sst [smem:[#allocation19_spill]] %s2440_s1 }
   0x3   :  { %10 = vsyncpa [#allocation4], 0 }
   0x4   :  { %11 = vsyncpa [#allocation7], 0 }
   0x5   :  { %13 = vsyncpa [#allocation7 + $0x1], 0 }
   0x6   :  { %14 = vsyncpa [#allocation10], 0 }
   0x7   :  { %16 = vsyncpa [#allocation10 + $0x1], 0 }
   0x8   :  { %17 = vsyncpa [#allocation5], 0  ;;  %s2125_s18 = smov 0   ;;  %s2127_s19 = smov 0  }
   0x9   :  { %s2129_s20 = smov 0   ;;  %s2131_s21 = smov 0  }
   0xa   :  { %s2133_s22 = smov 0   ;;  %s2135_s23 = smov 0  }
   0xb LB: > { %s2154_s24 = sadd.s32 4294967295, %s2082_s23   ;;  %s68_s25 = sadd.s32 1, %s2070_s20  ;;  %s2082_s23 = sphi %s2135_s23, %s23_s23   ;;  %s2078_s22 = sphi %s2133_s22, %s2464_s22   ;;  %s2074_s21 = sphi %s2131_s21, %s2463_s21   ;;  %s2070_s20 = sphi %s2129_s20, %s2462_s20   ;;  %s2066_s19 = sphi %s2127_s19, %s2461_s19   ;;  %s2062_s18 = sphi %s2125_s18, %s2460_s18  }
   0xc   : > { %p75_p0 = scmp.ne.s32.totalorder %s2070_s20, %s2066_s19  ;;  %p76_p1 = scmp.eq.s32.totalorder %s2082_s23, 0 }
   0xd   : > { %p81_p2 = scmp.ne.s32.totalorder %s2066_s19, %s2062_s18  ;;  %p2445_p3 = scmp.eq.s32.totalorder %s2154_s24, 0 }
   0xe   : > { %p77_p4 = por %p76_p1, %p75_p0  ;;  %p1423_p5 = scmp.ge.s32.totalorder %s2082_s23, 1 }
   0xf   : > { %p2165_p6 = por %p2445_p3, %p81_p2  ;;  %p191_p7 = scmp.lt.s32.totalorder %s2082_s23, 5 }
  0x10   : > { %s2084_s28 = smov [#allocation11]   ;;  %p1629_p10 = scmp.lt.s32.totalorder %s2082_s23, 4 }
  0x11   : > { %p2170_p8 = pnand %p1423_p5, %p191_p7  ;;  %s218_s29 = sshll.u32 %s2084_s28, 4  ;;  %s219_s29 = int_to_ptr.vmem [resolvable:$true] %s218_s29 }
  0x12   : > { %s2446_s30 = sand.u32 1, %s2082_s23   ;;  %p2184_p12 = pnand %p1629_p10, %p77_p4 }
  0x13   : > { %p1610_p9 = pneg %p2170_p8  ;;  %s1867_s8 = scalar_lea.vmem %s219_s29, 16 }
  0x14   : > { %p1868_p0 = scmp.ne.s32.totalorder %s219_s29, %s1867_s8  ;;  %s1874_s9 = scalar_lea.vmem %s219_s29, 32 }
  0x15   : > { %p2180_p11 = pnand %p1610_p9, %p2445_p3  ;;  %p1875_p5 = scmp.lt.s32.totalorder %s219_s29, %s219_s29 }
  0x16   : > { %p1876_p7 = scmp.lt.s32.totalorder %s1874_s9, %s1867_s8 }
  0x17   : > { %p1858_p13 = pneg %p2180_p11 }
  0x18   : > { %p1877_p9 = por %p1876_p7, %p1875_p5 }
  0x19   : > { %p1870_p1 = pnand %p1868_p0, %p1858_p13 }
  0x1b   : > { %p1871_p2 = pneg %p1870_p1 }
  0x1d   : > { %p1878_p3 = pnand %p1877_p9, %p1871_p2 }
  0x1f   : > { %1881 = shalt.err (!%p1878_p3)
}
  0x20   : > { %1616 = dma.hbm_to_vmem [thread:$0]  (!%p2180_p11), %s2443_s4, 16, %s219_s29, [#allocation10]  }
  0x21   : > { %s32_s12 = sadd.s32 1, %s2078_s22  ;;  %s2200_s13 = sand.u32 1, %s2070_s20  }
  0x22   : > { %p33_p3 = scmp.ge.s32.totalorder %s32_s12, 4  ;;  %s1590_s14 = smul.u32 768, %s2200_s13 }
  0x23   : > { %s1565_s15 = sshll.u32 %s2078_s22, 7  ;;  %s2453_s1 = sld [smem:[#allocation19_spill]] }
  0x24   : > { %s2466_s12 = smov (%p33_p3, %s32_s12), 0  ;;  %s233_s8 = scalar_lea.vmem [#allocation6], %s1590_s14 }
  0x25   : > { %s65_s28 = ssub.s32 %s2078_s22, %s2466_s12  ;;  %s240_s9 = sshll.u32 %s233_s8, 4  ;;  %s241_s9 = int_to_ptr.vmem [resolvable:$true] %s240_s9 }
  0x26   : > { %p66_p4 = scmp.eq.s32.totalorder %s65_s28, 0  ;;  %s2220_s10 = scalar_lea.sflag [#allocation7], %s2446_s30 }
  0x27   : > { %p1884_p10 = pneg %p2184_p12  ;;  %s1895_s11 = scalar_lea.vmem %s241_s9, 12288 }
  0x28   : > { %s2216_s29 = scalar_select %p66_p4, %s2070_s20, %s68_s25  }
  0x29   : > { %s2209_s18 = scalar_lea.hbm %s2453_s1, %s1565_s15  ;;  %p1896_p0 = scmp.ne.s32.totalorder %s241_s9, %s1895_s11 }
  0x2a   : > { %s2085_s15 = smov [#allocation6]  }
  0x2b   : > { %p1898_p1 = pnand %p1896_p0, %p1884_p10  ;;  %s1900_s16 = sshll.u32 %s2085_s15, 4  ;;  %s1901_s16 = int_to_ptr.vmem [resolvable:$false] %s1900_s16 }
  0x2c   : > { %s1902_s14 = scalar_lea.vmem %s1901_s16, 24576  ;;  %p1903_p5 = scmp.lt.s32.totalorder %s241_s9, %s1901_s16 }
  0x2d   : > { %p1899_p2 = pneg %p1898_p1  ;;  %p1904_p7 = scmp.lt.s32.totalorder %s1902_s14, %s1895_s11 }
  0x2f   : > { %p1905_p9 = por %p1904_p7, %p1903_p5 }
  0x31   : > { %p1906_p3 = pnand %p1905_p9, %p1899_p2 }
  0x33   : > { %1909 = shalt.err (!%p1906_p3)
}
  0x34   : > { %s2086_s25 = smov 512   ;;  %s2087_s17 = smov 128  }
  0x35   : > { %s2088_s28 = smov 8   ;;  %s2089_s8 = smov [#allocation3]  }
  0x36   : > { %1620 = dma.hbm_to_vmem [thread:$0]  (!%p2184_p12), %s2209_s18, 12288, %s241_s9, %s2220_s10, %s2086_s25, %s2087_s17, %s2088_s28  }
  0x37   : > { %s207_s30 = sshll.u32 %s2089_s8, 4  ;;  %s1429_s15 = sshll.u32 %s2200_s13, 1  ;;  %s208_s30 = int_to_ptr.vmem [resolvable:$true] %s207_s30 }
  0x38   : > { %s1921_s1 = scalar_lea.vmem %s208_s30, 384  ;;  %p1929_p2 = scmp.lt.s32.totalorder %s208_s30, %s208_s30 }
  0x39   : > { %p1922_p4 = scmp.ne.s32.totalorder %s208_s30, %s1921_s1  ;;  %p1930_p5 = scmp.lt.s32.totalorder %s1921_s1, %s1921_s1 }
  0x3b   : > { %p1924_p0 = pnand %p1922_p4, %p1858_p13  ;;  %p1931_p7 = por %p1930_p5, %p1929_p2 }
  0x3d   : > { %p1925_p1 = pneg %p1924_p0 }
  0x3f   : > { %p1932_p9 = pnand %p1931_p7, %p1925_p1 }
  0x41   : > { %1935 = shalt.err (!%p1932_p9)
}
  0x42   : > { %s2454_s0 = sld [smem:[#allocation18_spill]]  ;;  %s1566_s18 = sshll.u32 %s2078_s22, 5 }
  0x43   : > { %s260_s25 = scalar_lea.hbm %s2441_s2, %s1566_s18  ;;  %s254_s17 = scalar_lea.vmem [#allocation8], %s1429_s15 }
  0x44   : > { %s262_s28 = sshll.u32 %s254_s17, 4  ;;  %s2090_s6 = smov [#allocation8]   ;;  %s263_s28 = int_to_ptr.vmem [resolvable:$true] %s262_s28 }
  0x45   : > { %s1949_s1 = scalar_lea.vmem %s263_s28, 32  ;;  %s1954_s8 = sshll.u32 %s2090_s6, 4  ;;  %s1955_s8 = int_to_ptr.vmem [resolvable:$false] %s1954_s8 }
  0x46   : > { %p1950_p13 = scmp.ne.s32.totalorder %s263_s28, %s1949_s1  ;;  %s1956_s11 = scalar_lea.vmem %s1955_s8, 64 }
  0x47   : > { %p1957_p0 = scmp.lt.s32.totalorder %s263_s28, %s1955_s8 }
  0x48   : > { %1613 = dma.hbm_to_vmem [thread:$0]  (!%p2180_p11), %s2454_s0, 384, %s208_s30, [#allocation4]  }
  0x49   : > { %p1952_p3 = pnand %p1950_p13, %p1884_p10  ;;  %p1958_p11 = scmp.lt.s32.totalorder %s1956_s11, %s1949_s1 }
  0x4b   : > { %p1953_p4 = pneg %p1952_p3  ;;  %p1959_p1 = por %p1958_p11, %p1957_p0 }
  0x4d   : > { %p1960_p2 = pnand %p1959_p1, %p1953_p4 }
  0x4f   : > { %1963 = shalt.err (!%p1960_p2)
}
  0x50   : > { %1623 = dma.hbm_to_vmem [thread:$0]  (!%p2184_p12), %s260_s25, 32, %s263_s28, %s2220_s10  }
  0x51   : > { %s1432_s30 = sshll.u32 %s2200_s13, 7  ;;  %s1567_s15 = sshll.u32 %s2078_s22, 11 }
  0x52   : > { %s279_s9 = scalar_lea.hbm %s2442_s3, %s1567_s15  ;;  %s273_s14 = scalar_lea.vmem [#allocation9], %s1432_s30 }
  0x53   : > { %s280_s17 = sshll.u32 %s273_s14, 4  ;;  %s2455_s1 = sand.u32 1, %s2082_s23   ;;  %s281_s17 = int_to_ptr.vmem [resolvable:$true] %s280_s17 }
  0x54   : > { %s270_s6 = scalar_lea.sflag [#allocation10], %s2455_s1  ;;  %s1977_s8 = scalar_lea.vmem %s281_s17, 2048 }
  0x55   : > { %p1978_p5 = scmp.ne.s32.totalorder %s281_s17, %s1977_s8  ;;  %s2091_s11 = smov [#allocation9]  }
  0x56   : > { %s1982_s0 = sshll.u32 %s2091_s11, 4  ;;  %s1983_s0 = int_to_ptr.vmem [resolvable:$false] %s1982_s0 }
  0x57   : > { %p1980_p7 = pnand %p1978_p5, %p1884_p10  ;;  %s1984_s13 = scalar_lea.vmem %s1983_s0, 4096 }
  0x58   : > { %p1985_p13 = scmp.lt.s32.totalorder %s281_s17, %s1983_s0  ;;  %p1986_p3 = scmp.lt.s32.totalorder %s1984_s13, %s1977_s8 }
  0x59   : > { %p1981_p9 = pneg %p1980_p7 }
  0x5a   : > { %p1987_p4 = por %p1986_p3, %p1985_p13 }
  0x5c   : > { %p1988_p0 = pnand %p1987_p4, %p1981_p9 }
  0x5e   : > { %1991 = shalt.err (!%p1988_p0)
}
  0x5f   : > { %s2092_s10 = smov 64   ;;  %s2093_s25 = smov 4  }
  0x60   : > { %1626 = dma.hbm_to_vmem [thread:$0]  (!%p2184_p12), %s279_s9, 2048, %s281_s17, %s270_s6, %s2092_s10, %s2092_s10, %s2093_s25  }
  0x61   : > { %292 = sbr.rel (%p2170_p8) target bundleno = 676 (0x2a4), region = 40  ;;  %p2456_p10 = scmp.eq.s32.totalorder (!%p2170_p8), %s2154_s24, 0 }
  0x66   : > { %2041 = dma.done.wait (%p2456_p10), [#allocation4], 384   ;;  %p2457_p11 = pmov %p2456_p10 }
  0x67   : > { %s298_s0 = sand.u32 1, %s2154_s24   ;;  %s300_s28 = sand.u32 1, %s2066_s19  }
  0x68   : > { %2043 = vsyncadd (%p2457_p11), [#allocation4], 4294966912  ;;  %s1591_s30 = smul.u32 768, %s300_s28  ;;  %s299_s15 = scalar_lea.sflag [#allocation7], %s298_s0 }
  0x6a   : > { %s2270_s16 = scalar_lea.vmem [#allocation6], %s1591_s30 }
  0x6b   : > { %2045 = dma.done.wait (%p2165_p6), %s299_s15, 12320  }
  0x6c   : > { %2047 = vsyncadd (%p2165_p6), %s299_s15, 4294954976  ;;  %s1437_s27 = sshll.u32 %s300_s28, 1  ;;  %s1438_s7 = sshll.u32 %s300_s28, 7 }
  0x6d   : > { %s2276_s18 = scalar_lea.vmem [#allocation8], %s1437_s27  ;;  %s317_s9 = scalar_lea.sflag [#allocation10], %s298_s0 }
  0x6e   : > { %s2278_s14 = scalar_lea.vmem [#allocation9], %s1438_s7 }
  0x6f   : > { %2049 = dma.done.wait (%p2165_p6), %s317_s9, 2048  }
  0x70   : > { %2051 = vsyncadd (%p2165_p6), %s317_s9, 4294965248  ;;  %p2458_p8 = pmov %p2456_p10 }
  0x72   : > { %2053 = dma.done.wait (%p2458_p8), [#allocation10], 16   ;;  %p2459_p12 = pmov %p2458_p8 }
  0x73   : > { %p1440_p1 = scmp.ne.s32.totalorder %s2074_s21, 0 }
  0x74   : > { %2055 = vsyncadd (%p2459_p12), [#allocation10], 4294967280 }
  0x75   : > { %363 = sbr.rel (%p1440_p1) target bundleno = 124 (0x7c), region = 64 }
  0x7a   : > { %v1441_v0 = vld [vmem:[#allocation11] ss:$0 sm:$0xff] }
  0x7b   : > { %371 = vst [vmem:[#allocation2] sm:$0xff] %v1441_v0 }
  0x7c PF: > { %v1690_v1 = vld [vmem:[%s2270_s16 + $0x74] ss:$8 sps:$4 sm:$0xff]   ;;  %v1692_v2 = vld [vmem:[%s2270_s16 + $0x70] ss:$8 sps:$4 sm:$0xff]   ;;  %v1696_v5 = vld [vmem:[%s2270_s16 + $0x64] ss:$8 sps:$4 sm:$0xff]  }
  0x7d   : > { %984 = vmatprep.subr.bf16.mxu0 %v1690_v1  ;;  %v1693_v3 = vld [vmem:[%s2270_s16 + $0x174] ss:$8 sps:$4 sm:$0xff]   ;;  %v1695_v4 = vld [vmem:[%s2270_s16 + $0x170] ss:$8 sps:$4 sm:$0xff]   ;;  %v1698_v6 = vld [vmem:[%s2270_s16 + $0x60] ss:$8 sps:$4 sm:$0xff]  }
  0x7e   : > { %985 = vmatpush1.bf16.msra.mxu0 %v1692_v2  ;;  %1025 = vmatprep.subr.bf16.mxu1 %v1693_v3  ;;  %v1699_v7 = vld [vmem:[%s2270_s16 + $0x164] ss:$8 sps:$4 sm:$0xff]   ;;  %v1701_v8 = vld [vmem:[%s2270_s16 + $0x160] ss:$8 sps:$4 sm:$0xff]   ;;  %v1702_v9 = vld [vmem:[%s2270_s16 + $0x54] ss:$8 sps:$4 sm:$0xff]  }
  0x7f   : > { %1026 = vmatpush1.bf16.msra.mxu1 %v1695_v4  ;;  %986 = vmatprep.subr.bf16.mxu0 %v1696_v5  ;;  %v1704_v10 = vld [vmem:[%s2270_s16 + $0x50] ss:$8 sps:$4 sm:$0xff]   ;;  %v1705_v11 = vld [vmem:[%s2270_s16 + $0x154] ss:$8 sps:$4 sm:$0xff]   ;;  %v1708_v12 = vld [vmem:[%s2270_s16 + $0x44] ss:$8 sps:$4 sm:$0xff]  }
  0x80   : > { %1027 = vmatprep.subr.bf16.mxu1 %v1699_v7  ;;  %v1707_v13 = vld [vmem:[%s2270_s16 + $0x150] ss:$8 sps:$4 sm:$0xff]   ;;  %v1711_v14 = vld [vmem:[%s2270_s16 + $0x144] ss:$8 sps:$4 sm:$0xff]   ;;  %v1710_v15 = vld [vmem:[%s2270_s16 + $0x40] ss:$8 sps:$4 sm:$0xff]  }
  0x81   : > { %v1714_v16 = vld [vmem:[%s2270_s16 + $0x34] ss:$8 sps:$4 sm:$0xff]   ;;  %v1713_v17 = vld [vmem:[%s2270_s16 + $0x140] ss:$8 sps:$4 sm:$0xff]   ;;  %v1716_v19 = vld [vmem:[%s2270_s16 + $0x30] ss:$8 sps:$4 sm:$0xff]  }
  0x82   : > { %987 = vmatpush1.bf16.msra.mxu0 %v1698_v6  ;;  %v1717_v18 = vld [vmem:[%s2270_s16 + $0x134] ss:$8 sps:$4 sm:$0xff]   ;;  %v1720_v20 = vld [vmem:[%s2270_s16 + $0x24] ss:$8 sps:$4 sm:$0xff]   ;;  %v1719_v21 = vld [vmem:[%s2270_s16 + $0x130] ss:$8 sps:$4 sm:$0xff]  }
  0x83   : > { %988 = vmatprep.subr.bf16.mxu0 %v1702_v9  ;;  %1028 = vmatpush1.bf16.msra.mxu1 %v1701_v8  ;;  %v1723_v22 = vld [vmem:[%s2270_s16 + $0x124] ss:$8 sps:$4 sm:$0xff]   ;;  %v1722_v23 = vld [vmem:[%s2270_s16 + $0x20] ss:$8 sps:$4 sm:$0xff]   ;;  %v1726_v24 = vld [vmem:[%s2270_s16 + $0x14] ss:$8 sps:$4 sm:$0xff]  }
  0x84   : > { %1029 = vmatprep.subr.bf16.mxu1 %v1705_v11  ;;  %v1725_v25 = vld [vmem:[%s2270_s16 + $0x120] ss:$8 sps:$4 sm:$0xff]   ;;  %v1729_v26 = vld [vmem:[%s2270_s16 + $0x114] ss:$8 sps:$4 sm:$0xff]   ;;  %v1728_v27 = vld [vmem:[%s2270_s16 + $0x10] ss:$8 sps:$4 sm:$0xff]  }
  0x85   : > { %v1732_v28 = vld [vmem:[%s2270_s16 + $0x4] ss:$8 sps:$4 sm:$0xff]   ;;  %v1731_v29 = vld [vmem:[%s2270_s16 + $0x110] ss:$8 sps:$4 sm:$0xff]   ;;  %v1734_v31 = vld [vmem:[%s2270_s16] ss:$8 sps:$4 sm:$0xff]  }
  0x86   : > { %989 = vmatpush1.bf16.msra.mxu0 %v1704_v10  ;;  %v1735_v30 = vld [vmem:[%s2270_s16 + $0x104] ss:$8 sps:$4 sm:$0xff]   ;;  %v1738_v32 = vld [vmem:[%s2270_s16 + $0xf4] ss:$8 sps:$4 sm:$0xff]   ;;  %v1737_v33 = vld [vmem:[%s2270_s16 + $0x100] ss:$8 sps:$4 sm:$0xff]  }
  0x87   : > { %990 = vmatprep.subr.bf16.mxu0 %v1708_v12  ;;  %1030 = vmatpush1.bf16.msra.mxu1 %v1707_v13  ;;  %v1741_v34 = vld [vmem:[%s2270_s16 + $0x1f4] ss:$8 sps:$4 sm:$0xff]   ;;  %v1740_v35 = vld [vmem:[%s2270_s16 + $0xf0] ss:$8 sps:$4 sm:$0xff]   ;;  %v1744_v36 = vld [vmem:[%s2270_s16 + $0xe4] ss:$8 sps:$4 sm:$0xff]  }
  0x88   : > { %1031 = vmatprep.subr.bf16.mxu1 %v1711_v14  ;;  %v1743_v37 = vld [vmem:[%s2270_s16 + $0x1f0] ss:$8 sps:$4 sm:$0xff]   ;;  %v1747_v38 = vld [vmem:[%s2270_s16 + $0x1e4] ss:$8 sps:$4 sm:$0xff]   ;;  %v1746_v39 = vld [vmem:[%s2270_s16 + $0xe0] ss:$8 sps:$4 sm:$0xff]  }
  0x89   : > { %v1750_v40 = vld [vmem:[%s2270_s16 + $0xd4] ss:$8 sps:$4 sm:$0xff]   ;;  %v1749_v41 = vld [vmem:[%s2270_s16 + $0x1e0] ss:$8 sps:$4 sm:$0xff]   ;;  %v1752_v43 = vld [vmem:[%s2270_s16 + $0xd0] ss:$8 sps:$4 sm:$0xff]  }
  0x8a   : > { %991 = vmatpush1.bf16.msra.mxu0 %v1710_v15  ;;  %v1753_v42 = vld [vmem:[%s2270_s16 + $0x1d4] ss:$8 sps:$4 sm:$0xff]   ;;  %v1756_v44 = vld [vmem:[%s2270_s16 + $0xc4] ss:$8 sps:$4 sm:$0xff]   ;;  %v1755_v45 = vld [vmem:[%s2270_s16 + $0x1d0] ss:$8 sps:$4 sm:$0xff]  }
  0x8b   : > { %992 = vmatprep.subr.bf16.mxu0 %v1714_v16  ;;  %1032 = vmatpush1.bf16.msra.mxu1 %v1713_v17  ;;  %v1759_v46 = vld [vmem:[%s2270_s16 + $0x1c4] ss:$8 sps:$4 sm:$0xff]   ;;  %v1758_v48 = vld [vmem:[%s2270_s16 + $0xc0] ss:$8 sps:$4 sm:$0xff]   ;;  %v1762_v50 = vld [vmem:[%s2270_s16 + $0xb4] ss:$8 sps:$4 sm:$0xff]  }
  0x8c   : > { %1033 = vmatprep.subr.bf16.mxu1 %v1717_v18  ;;  %v372_v47 = vld [vmem:[#allocation3] sm:$0xff]  ;;  %v373_v51 = vld [vmem:[#allocation3 + $0x8] sm:$0xff]  ;;  %v2356_v10 = vld [vmem:[#allocation3 + $0x10] sm:$0xff]  ;;  %p1560_p6 = scmp.ne.s32.totalorder %s2074_s21, 3 }
  0x8d   : > { %v1443_v49 = vcombine.high %v372_v47, %v372_v47  ;;  %v1761_v52 = vld [vmem:[%s2270_s16 + $0x1c0] ss:$8 sps:$4 sm:$0xff]   ;;  %v1445_v53 = vcombine.high %v373_v51, %v373_v51  ;;  %v1765_v54 = vld [vmem:[%s2270_s16 + $0x1b4] ss:$8 sps:$4 sm:$0xff]   ;;  %v1764_v55 = vld [vmem:[%s2270_s16 + $0xb0] ss:$8 sps:$4 sm:$0xff]   ;;  %v1442_v6 = vcombine.low %v372_v47, %v372_v47  ;;  %v1444_v8 = vcombine.low %v373_v51, %v373_v51 }
  0x8e   : > { %993 = vmatpush1.bf16.msra.mxu0 %v1716_v19  ;;  %v1768_v56 = vld [vmem:[%s2270_s16 + $0xa4] ss:$8 sps:$4 sm:$0xff]   ;;  %v1767_v57 = vld [vmem:[%s2270_s16 + $0x1b0] ss:$8 sps:$4 sm:$0xff]   ;;  %v1770_v59 = vld [vmem:[%s2270_s16 + $0xa0] ss:$8 sps:$4 sm:$0xff]   ;;  %v1447_v12 = vcombine.high %v2356_v10, %v2356_v10 }
  0x8f   : > { %994 = vmatprep.subr.bf16.mxu0 %v1720_v20  ;;  %1034 = vmatpush1.bf16.msra.mxu1 %v1719_v21  ;;  %v1771_v58 = vld [vmem:[%s2270_s16 + $0x1a4] ss:$8 sps:$4 sm:$0xff]   ;;  %v1774_v60 = vld [vmem:[%s2270_s16 + $0x94] ss:$8 sps:$4 sm:$0xff]   ;;  %v1773_v61 = vld [vmem:[%s2270_s16 + $0x1a0] ss:$8 sps:$4 sm:$0xff]  }
  0x90   : > { %1035 = vmatprep.subr.bf16.mxu1 %v1723_v22  ;;  %1016 = vmatprep.mubr.bf16.mxu0 %v1443_v49  ;;  %v1777_v62 = vld [vmem:[%s2270_s16 + $0x194] ss:$8 sps:$4 sm:$0xff]   ;;  %v1776_v63 = vld [vmem:[%s2270_s16 + $0x90] ss:$8 sps:$4 sm:$0xff]   ;;  %v1780_v0 = vld [vmem:[%s2270_s16 + $0x84] ss:$8 sps:$4 sm:$0xff]  }
  0x91   : > { %1057 = vmatprep.mubr.bf16.mxu1 %v1445_v53  ;;  %v1779_v1 = vld [vmem:[%s2270_s16 + $0x190] ss:$8 sps:$4 sm:$0xff]   ;;  %v1783_v2 = vld [vmem:[%s2270_s16 + $0x184] ss:$8 sps:$4 sm:$0xff]   ;;  %v1782_v3 = vld [vmem:[%s2270_s16 + $0x80] ss:$8 sps:$4 sm:$0xff]  }
  0x92   : > { %995 = vmatpush1.bf16.msra.mxu0 %v1722_v23  ;;  %v1790_v4 = vld [vmem:[%s2270_s16 + $0x274] ss:$8 sps:$4 sm:$0xff]   ;;  %v1787_v5 = vld [vmem:[%s2270_s16 + $0x180] ss:$8 sps:$4 sm:$0xff]   ;;  %v1788_v7 = vld [vmem:[%s2270_s16 + $0x270] ss:$8 sps:$4 sm:$0xff]  }
  0x93   : > { %996 = vmatprep.subr.bf16.mxu0 %v1726_v24  ;;  %1036 = vmatpush1.bf16.msra.mxu1 %v1725_v25  ;;  %v1795_v9 = vld [vmem:[%s2270_s16 + $0x264] ss:$8 sps:$4 sm:$0xff]   ;;  %v1793_v11 = vld [vmem:[%s2270_s16 + $0x260] ss:$8 sps:$4 sm:$0xff]   ;;  %v1798_v13 = vld [vmem:[%s2270_s16 + $0x254] ss:$8 sps:$4 sm:$0xff]  }
  0x94   : > { %1037 = vmatprep.subr.bf16.mxu1 %v1729_v26  ;;  %v1796_v14 = vld [vmem:[%s2270_s16 + $0x250] ss:$8 sps:$4 sm:$0xff]   ;;  %v1801_v15 = vld [vmem:[%s2270_s16 + $0x244] ss:$8 sps:$4 sm:$0xff]   ;;  %v1799_v16 = vld [vmem:[%s2270_s16 + $0x240] ss:$8 sps:$4 sm:$0xff]  }
  0x95   : > { %v1804_v17 = vld [vmem:[%s2270_s16 + $0x234] ss:$8 sps:$4 sm:$0xff]   ;;  %v1802_v18 = vld [vmem:[%s2270_s16 + $0x230] ss:$8 sps:$4 sm:$0xff]   ;;  %v1807_v19 = vld [vmem:[%s2270_s16 + $0x224] ss:$8 sps:$4 sm:$0xff]  }
  0x96   : > { %997 = vmatpush1.bf16.msra.mxu0 %v1728_v27  ;;  %v1805_v20 = vld [vmem:[%s2270_s16 + $0x220] ss:$8 sps:$4 sm:$0xff]   ;;  %v1810_v21 = vld [vmem:[%s2270_s16 + $0x214] ss:$8 sps:$4 sm:$0xff]   ;;  %v1808_v22 = vld [vmem:[%s2270_s16 + $0x210] ss:$8 sps:$4 sm:$0xff]  }
  0x97   : > { %998 = vmatprep.subr.bf16.mxu0 %v1732_v28  ;;  %1038 = vmatpush1.bf16.msra.mxu1 %v1731_v29  ;;  %v1813_v23 = vld [vmem:[%s2270_s16 + $0x204] ss:$8 sps:$4 sm:$0xff]   ;;  %v1811_v24 = vld [vmem:[%s2270_s16 + $0x200] ss:$8 sps:$4 sm:$0xff]   ;;  %v1816_v25 = vld [vmem:[%s2270_s16 + $0x2f4] ss:$8 sps:$4 sm:$0xff]  }
  0x98   : > { %1039 = vmatprep.subr.bf16.mxu1 %v1735_v30  ;;  %v1814_v26 = vld [vmem:[%s2270_s16 + $0x2f0] ss:$8 sps:$4 sm:$0xff]   ;;  %v1819_v27 = vld [vmem:[%s2270_s16 + $0x2e4] ss:$8 sps:$4 sm:$0xff]   ;;  %v1817_v28 = vld [vmem:[%s2270_s16 + $0x2e0] ss:$8 sps:$4 sm:$0xff]  }
  0x99   : > { %v1822_v29 = vld [vmem:[%s2270_s16 + $0x2d4] ss:$8 sps:$4 sm:$0xff]   ;;  %v1820_v30 = vld [vmem:[%s2270_s16 + $0x2d0] ss:$8 sps:$4 sm:$0xff]   ;;  %v1847_v49 = vld [vmem:[%s2278_s14 + $0x20] sm:$0xff]  }
  0x9a   : > { %999 = vmatpush1.bf16.msra.mxu0 %v1734_v31  ;;  %v1825_v31 = vld [vmem:[%s2270_s16 + $0x2c4] ss:$8 sps:$4 sm:$0xff]   ;;  %v1849_v51 = vld [vmem:[%s2278_s14 + $0x18] sm:$0xff]   ;;  %v1851_v53 = vld [vmem:[%s2278_s14 + $0x10] sm:$0xff]  }
  0x9b   : > { %1000 = vmatprep.subr.bf16.mxu0 %v1738_v32  ;;  %1040 = vmatpush1.bf16.msra.mxu1 %v1737_v33  ;;  %v1823_v32 = vld [vmem:[%s2270_s16 + $0x2c0] ss:$8 sps:$4 sm:$0xff]   ;;  %v1828_v33 = vld [vmem:[%s2270_s16 + $0x2b4] ss:$8 sps:$4 sm:$0xff]   ;;  %v1845_v47 = vld [vmem:[%s2278_s14 + $0x28] sm:$0xff]  }
  0x9c   : > { %1041 = vmatprep.subr.bf16.mxu1 %v1741_v34  ;;  %v1826_v34 = vld [vmem:[%s2270_s16 + $0x2b0] ss:$8 sps:$4 sm:$0xff]  }
  0x9e   : > { %1001 = vmatpush2.bf16.msra.mxu0 %v1740_v35  ;;  %v1831_v35 = vld [vmem:[%s2270_s16 + $0x2a4] ss:$8 sps:$4 sm:$0xff]  }
  0x9f   : > { %1002 = vmatprep.subr.bf16.mxu0 %v1744_v36  ;;  %1042 = vmatpush2.bf16.msra.mxu1 %v1743_v37  ;;  %v1829_v36 = vld [vmem:[%s2270_s16 + $0x2a0] ss:$8 sps:$4 sm:$0xff]   ;;  %v1834_v37 = vld [vmem:[%s2270_s16 + $0x294] ss:$8 sps:$4 sm:$0xff]  }
  0xa0   : > { %1043 = vmatprep.subr.bf16.mxu1 %v1747_v38  ;;  %v1832_v38 = vld [vmem:[%s2270_s16 + $0x290] ss:$8 sps:$4 sm:$0xff]  }
  0xa2   : > { %1003 = vmatpush2.bf16.msra.mxu0 %v1746_v39  ;;  %v1837_v39 = vld [vmem:[%s2270_s16 + $0x284] ss:$8 sps:$4 sm:$0xff]  }
  0xa3   : > { %1004 = vmatprep.subr.bf16.mxu0 %v1750_v40  ;;  %1044 = vmatpush2.bf16.msra.mxu1 %v1749_v41  ;;  %v1835_v40 = vld [vmem:[%s2270_s16 + $0x280] ss:$8 sps:$4 sm:$0xff]   ;;  %v1446_v41 = vcombine.low %v2356_v10, %v2356_v10 }
  0xa4   : > { %1045 = vmatprep.subr.bf16.mxu1 %v1753_v42  ;;  %v1840_v42 = vld [vmem:[%s2278_s14 + $0x78] sm:$0xff]  }
  0xa6   : > { %1005 = vmatpush2.bf16.msra.mxu0 %v1752_v43  ;;  %v1841_v43 = vld [vmem:[%s2278_s14 + $0x38] sm:$0xff]  }
  0xa7   : > { %1006 = vmatprep.subr.bf16.mxu0 %v1756_v44  ;;  %1046 = vmatpush2.bf16.msra.mxu1 %v1755_v45  ;;  %v1842_v44 = vld [vmem:[%s2278_s14 + $0x70] sm:$0xff]  }
  0xa8   : > { %1047 = vmatprep.subr.bf16.mxu1 %v1759_v46  ;;  %v1843_v45 = vld [vmem:[%s2278_s14 + $0x30] sm:$0xff]   ;;  %v1844_v46 = vld [vmem:[%s2278_s14 + $0x68] sm:$0xff]  }
  0xaa   : > { %1007 = vmatpush2.bf16.msra.mxu0 %v1758_v48  ;;  %v1846_v48 = vld [vmem:[%s2278_s14 + $0x60] sm:$0xff]  }
  0xab   : > { %1008 = vmatprep.subr.bf16.mxu0 %v1762_v50  ;;  %1048 = vmatpush2.bf16.msra.mxu1 %v1761_v52  ;;  %v1848_v50 = vld [vmem:[%s2278_s14 + $0x58] sm:$0xff]   ;;  %v1850_v52 = vld [vmem:[%s2278_s14 + $0x50] sm:$0xff]  }
  0xac   : > { %1049 = vmatprep.subr.bf16.mxu1 %v1765_v54  ;;  %v1852_v54 = vld [vmem:[%s2278_s14 + $0x48] sm:$0xff]  }
  0xae   : > { %1009 = vmatpush2.bf16.msra.mxu0 %v1764_v55  ;;  %v1853_v55 = vld [vmem:[%s2278_s14 + $0x8] sm:$0xff]  }
  0xaf   : > { %1010 = vmatprep.subr.bf16.mxu0 %v1768_v56  ;;  %1050 = vmatpush2.bf16.msra.mxu1 %v1767_v57  ;;  %v1854_v56 = vld [vmem:[%s2278_s14 + $0x40] sm:$0xff]  }
  0xb0   : > { %1051 = vmatprep.subr.bf16.mxu1 %v1771_v58  ;;  %v1855_v57 = vld [vmem:[%s2278_s14] sm:$0xff]  }
  0xb2   : > { %1011 = vmatpush2.bf16.msra.mxu0 %v1770_v59 }
  0xb3   : > { %1012 = vmatprep.subr.bf16.mxu0 %v1774_v60  ;;  %1052 = vmatpush2.bf16.msra.mxu1 %v1773_v61 }
  0xb4   : > { %1053 = vmatprep.subr.bf16.mxu1 %v1777_v62 }
  0xb6   : > { %1013 = vmatpush2.bf16.msra.mxu0 %v1776_v63 }
  0xb7   : > { %1014 = vmatprep.subr.bf16.mxu0 %v1780_v0  ;;  %1054 = vmatpush2.bf16.msra.mxu1 %v1779_v1 }
  0xb8   : > { %1055 = vmatprep.subr.bf16.mxu1 %v1783_v2  ;;  %v473_v2 = vlaneseq }
  0xba   : > { %1015 = vmatpush2.bf16.msra.mxu0 %v1782_v3  ;;  %v474_v3 = vshrl.u32 %v473_v2, 7 }
  0xbb   : > { %1066 = vmatprep.subr.bf16.mxu0 %v1790_v4  ;;  %1056 = vmatpush2.bf16.msra.mxu1 %v1787_v5  ;;  %v471_v5 = vld [vmem:[%s2276_s18] sm:$0x3] }
  0xbc   : > { %1568 = vmatprep.subr.bf16.mxu1 %v1840_v42  ;;  %v475_v4 = vsub.s32 0, %v474_v3 }
  0xbd   : > { %1017 = vmatmul.mubr.bf16.vlgmr.msra.gmra.mxu0 %v1442_v6  ;;  %v479_v6 = vsub.s32 1, %v474_v3 }
  0xbe   : > { %1067 = vmatpush1.bf16.msra.mxu0 %v1788_v7  ;;  %1098 = vmatprep.mubr.bf16.mxu0 %v1447_v12  ;;  %v476_v7 = vrot.slane %v471_v5, %v475_v4 }
  0xbf   : > { %1058 = vmatmul.mubr.bf16.vlgmr.msra.gmra.mxu1 %v1444_v8  ;;  %1068 = vmatprep.subr.bf16.mxu0 %v1795_v9  ;;  %v480_v8 = vrot.slane %v471_v5, %v479_v6 }
  0xc0   : > { %1569 = vmatpush3.bf16.msra.mxu1 %v1841_v43 }
  0xc1   : > { %1570 = vmatprep.subr.bf16.mxu1 %v1842_v44 }
  0xc2   : > { %1069 = vmatpush1.bf16.msra.mxu0 %v1793_v11 }
  0xc3   : > { %1070 = vmatprep.subr.bf16.mxu0 %v1798_v13 }
  0xc4   : > { %1571 = vmatpush3.bf16.msra.mxu1 %v1843_v45 }
  0xc5   : > { %1572 = vmatprep.subr.bf16.mxu1 %v1844_v46 }
  0xc6   : > { %1071 = vmatpush1.bf16.msra.mxu0 %v1796_v14 }
  0xc7   : > { %1072 = vmatprep.subr.bf16.mxu0 %v1801_v15 }
  0xc8   : > { %1573 = vmatpush3.bf16.msra.mxu1 %v1845_v47 }
  0xc9   : > { %1574 = vmatprep.subr.bf16.mxu1 %v1846_v48 }
  0xca   : > { %1073 = vmatpush1.bf16.msra.mxu0 %v1799_v16 }
  0xcb   : > { %1074 = vmatprep.subr.bf16.mxu0 %v1804_v17 }
  0xcc   : > { %1575 = vmatpush3.bf16.msra.mxu1 %v1847_v49 }
  0xcd   : > { %1576 = vmatprep.subr.bf16.mxu1 %v1848_v50 }
  0xce   : > { %1075 = vmatpush1.bf16.msra.mxu0 %v1802_v18 }
  0xcf   : > { %1076 = vmatprep.subr.bf16.mxu0 %v1807_v19 }
  0xd0   : > { %1577 = vmatpush3.bf16.msra.mxu1 %v1849_v51 }
  0xd1   : > { %1578 = vmatprep.subr.bf16.mxu1 %v1850_v52 }
  0xd2   : > { %1077 = vmatpush1.bf16.msra.mxu0 %v1805_v20 }
  0xd3   : > { %1078 = vmatprep.subr.bf16.mxu0 %v1810_v21 }
  0xd4   : > { %1579 = vmatpush3.bf16.msra.mxu1 %v1851_v53 }
  0xd5   : > { %1580 = vmatprep.subr.bf16.mxu1 %v1852_v54 }
  0xd6   : > { %1079 = vmatpush1.bf16.msra.mxu0 %v1808_v22  ;;  %v1107_v22 = vld [vmem:[#allocation2] sm:$0xff] }
  0xd7   : > { %1080 = vmatprep.subr.bf16.mxu0 %v1813_v23 }
  0xd8   : > { %1581 = vmatpush3.bf16.msra.mxu1 %v1853_v55 }
  0xd9   : > { %1582 = vmatprep.subr.bf16.mxu1 %v1854_v56 }
  0xda   : > { %1081 = vmatpush1.bf16.msra.mxu0 %v1811_v24 }
  0xdb   : > { %1082 = vmatprep.subr.bf16.mxu0 %v1816_v25 }
  0xdc   : > { %1583 = vmatpush3.bf16.msra.mxu1 %v1855_v57 }
  0xde   : > { %1083 = vmatpush2.bf16.msra.mxu0 %v1814_v26 }
  0xdf   : > { %1084 = vmatprep.subr.bf16.mxu0 %v1819_v27 }
  0xe2   : > { %1085 = vmatpush2.bf16.msra.mxu0 %v1817_v28 }
  0xe3   : > { %1086 = vmatprep.subr.bf16.mxu0 %v1822_v29 }
  0xe6   : > { %1087 = vmatpush2.bf16.msra.mxu0 %v1820_v30 }
  0xe7   : > { %1088 = vmatprep.subr.bf16.mxu0 %v1825_v31 }
  0xea   : > { %1089 = vmatpush2.bf16.msra.mxu0 %v1823_v32 }
  0xeb   : > { %1090 = vmatprep.subr.bf16.mxu0 %v1828_v33 }
  0xee   : > { %1091 = vmatpush2.bf16.msra.mxu0 %v1826_v34 }
  0xef   : > { %1092 = vmatprep.subr.bf16.mxu0 %v1831_v35 }
  0xf2   : > { %1093 = vmatpush2.bf16.msra.mxu0 %v1829_v36 }
  0xf3   : > { %1094 = vmatprep.subr.bf16.mxu0 %v1834_v37 }
  0xf6   : > { %1095 = vmatpush2.bf16.msra.mxu0 %v1832_v38 }
  0xf7   : > { %1096 = vmatprep.subr.bf16.mxu0 %v1837_v39 }
  0xfa   : > { %1097 = vmatpush2.bf16.msra.mxu0 %v1835_v40 }
  0xfd   : > { %1099 = vmatmul.mubr.bf16.vlgmr.msra.gmra.mxu0 %v1446_v41 }
 0x17d   : > { %v1018_v58 = vpop.f32.mrf.mxu0 }
 0x17e   : > { %v1019_v9 = vadd.f32 %v1018_v58, %v476_v7 }
 0x17f   : > { %v1020_v59 = vpop.f32.mrf.mxu0  ;;  %v1059_v60 = vpop.f32.mrf.mxu1 }
 0x180   : > { %v1021_v10 = vadd.f32 %v1020_v59, %v480_v8  ;;  %v1060_v11 = vadd.f32 %v1059_v60, %v1019_v9 }
 0x181   : > { %v1022_v61 = vpop.f32.mrf.mxu0  ;;  %v1061_v62 = vpop.f32.mrf.mxu1 }
 0x182   : > { %v1062_v13 = vadd.f32 %v1061_v62, %v1021_v10 }
 0x183   : > { %v1023_v63 = vpop.f32.mrf.mxu0  ;;  %v1063_v0 = vpop.f32.mrf.mxu1 }
 0x185   : > { %v1064_v1 = vpop.f32.mrf.mxu1 }
 0x1bd   : > { %v1100_v12 = vpop.f32.mrf.mxu0 }
 0x1be   : > { %v1101_v14 = vadd.f32 %v1100_v12, %v1060_v11 }
 0x1bf   : > { %v1102_v15 = vpop.f32.mrf.mxu0 }
 0x1c0   : > { %v1103_v16 = vadd.f32 %v1102_v15, %v1062_v13  ;;  %v1108_v19 = vpack.c.bf16 %v1101_v14, %v1101_v14 }
 0x1c1   : > { %v1104_v17 = vpop.f32.mrf.mxu0 }
 0x1c2   : > { %v1109_v18 = vpack.c.bf16 %v1103_v16, %v1103_v16 }
 0x1c3   : > { %v1105_v20 = vpop.f32.mrf.mxu0 }
 0x1c4   : > { %1270 = vmatprep.mubr.bf16.mxu1 %v1109_v18 }
 0x1c5   : > { %1271 = vmatmul.mubr.bf16.vlgmr.msra.gmra.mxu1 %v1108_v19 }
 0x285   : > { %v1584_v21 = vpop.f32.mrf.mxu1 }
 0x287   : > { %v1585_v23 = vpop.f32.mrf.mxu1 }
 0x288   : > { %v1586_v24 = vadd.f32 %v1585_v23, %v1584_v21  ;;  %1283 = sbr.rel (%p1560_p6) target bundleno = 661 (0x295), region = 68 }
 0x289   : > { %v1587_v25 = vpop.f32.mrf.mxu1 }
 0x28a   : > { %v1278_v26 = vadd.f32 %v1586_v24, %v1107_v22 }
 0x28b   : > { %v1588_v27 = vpop.f32.mrf.mxu1 }
 0x28c   : > { %1279 = vst [vmem:[#allocation2] sm:$0xff] %v1278_v26 }
 0x293   : > { %v1284_v28 = vld [vmem:[#allocation2] sm:$0xff] }
 0x294   : > { %1285 = vst [vmem:[#allocation12] sm:$0xff] %v1284_v28 }
 0x295 PF: > { %p1632_p2 = scmp.eq.s32.totalorder %s2154_s24, 3  ;;  %s2094_s26 = smov [#allocation12]  }
 0x296   : > { %s1295_s17 = sshll.u32 %s2094_s26, 4  ;;  %s1296_s17 = int_to_ptr.vmem [resolvable:$true] %s1295_s17 }
 0x297   : > { %s1992_s1 = scalar_lea.vmem %s1296_s17, 128  ;;  %p1999_p13 = scmp.lt.s32.totalorder %s1296_s17, %s1296_s17 }
 0x298   : > { %p1993_p5 = scmp.ne.s32.totalorder %s1296_s17, %s1992_s1  ;;  %p2000_p3 = scmp.lt.s32.totalorder %s1992_s1, %s1992_s1 }
 0x29a   : > { %p1994_p7 = pnand %p1993_p5, %p1632_p2  ;;  %p2001_p4 = por %p2000_p3, %p1999_p13 }
 0x29c   : > { %p1995_p9 = pneg %p1994_p7 }
 0x29e   : > { %p2002_p0 = pnand %p2001_p4, %p1995_p9 }
 0x2a0   : > { %2005 = shalt.err (!%p2002_p0)
}
 0x2a1   : > { %1607 = dma.vmem_to_hbm [thread:$0]  (%p1632_p2), %s1296_s17, 128, %s2444_s5, [#allocation5]  }
 0x2a2   : > { %2057 = dma.done.wait (%p1632_p2), [#allocation5], 128  }
 0x2a3   : > { %2059 = vsyncadd (%p1632_p2), [#allocation5], 4294967168 }
 0x2a4 PF: > { %s23_s23 = sadd.s32 1, %s2082_s23   ;;  %s2460_s18 = smov %s2066_s19 }
 0x2a5   : > { %p20_p10 = scmp.ge.s32.totalorder %s23_s23, 6   ;;  %s2461_s19 = smov %s2070_s20 }
 0x2a6   : > { %s2462_s20 = smov %s2216_s29  ;;  %s2463_s21 = smov %s2078_s22 }
 0x2a7   : > { %s2464_s22 = smov %s2466_s12  ;;  %22 = sbr.rel (!%p20_p10) target bundleno = 11 (0xb), region = 120 }
 0x2ac   :  { %1308 = vsyncpa [#allocation4], 1 }
 0x2ad   :  { %1310 = vsyncpa [#allocation4 + $0x1], 1 }
 0x2ae   :  { %1311 = vsyncpa [#allocation7], 1 }
 0x2af   :  { %1313 = vsyncpa [#allocation7 + $0x1], 1 }
 0x2b0   :  { %1314 = vsyncpa [#allocation10], 1 }
 0x2b1   :  { %1316 = vsyncpa [#allocation10 + $0x1], 1 }
 0x2b2   :  { %1317 = vsyncpa [#allocation5], 1 }
 0x2b3   :  { %1319 = vsyncpa [#allocation5 + $0x1], 1 }

</bundles_post_ra>
